<compile_context>
chip_gen: v6e
topology: v6e:2x2x1
jax: 0.10.0
libtpu: 0.0.40
codegen_flags: <defaults>
</compile_context>

<pallas_src>
import functools

import jax
import jax.numpy as jnp
from jax.experimental import pallas as pl
from jax.experimental.pallas import tpu as pltpu

D_MODEL = 32
EPS = 1e-5  # nn.LayerNorm default eps


# ------------------------------ fused kernel ------------------------------- #
def fused_sublayer_kernel(x_ref, g_ref, beta_ref, w_ref, bias_ref, *rest,
                          p, use_dropout):
    """LN -> Linear+ReLU -> dropout -> residual add, on one (TILE_M, D) tile."""
    if use_dropout:
        u_ref, o_ref = rest
    else:
        (o_ref,) = rest

    x = x_ref[...].astype(jnp.float32)

    # --- LayerNorm (biased variance, same as torch nn.LayerNorm) -----------
    mean = jnp.mean(x, axis=-1, keepdims=True)
    xc = x - mean
    var = jnp.mean(xc * xc, axis=-1, keepdims=True)
    inv = jax.lax.rsqrt(var + EPS)
    n = xc * inv * g_ref[...].astype(jnp.float32) + beta_ref[...].astype(jnp.float32)

    # --- synthetic sublayer: Linear(D, D) + ReLU (MXU) ----------------------
    h = jnp.dot(n, w_ref[...].astype(jnp.float32),
                preferred_element_type=jnp.float32)
    h = h + bias_ref[...].astype(jnp.float32)
    s = jnp.maximum(h, 0.0)

    # --- inverted dropout + residual ----------------------------------------
    if use_dropout:
        if p >= 1.0:
            s = jnp.zeros_like(s)
        else:
            keep = u_ref[...] >= jnp.float32(p)          # P(keep) = 1 - p
            s = jnp.where(keep, s * (1.0 / (1.0 - p)), 0.0)

    o_ref[...] = (x + s).astype(o_ref.dtype)


# -------------------------------- wrapper ---------------------------------- #
def _pick_tile_m(m):
    if m >= 512:
        return 512
    return max(8, ((m + 7) // 8) * 8)


def sublayer_connection(x, gamma, beta, W, b_lin, *, p, training, dropout_u=None):
    """x + dropout(ReLU(LayerNorm(x) @ W + b)), x: (B, S, D)."""
    B, S, D = x.shape
    M = B * S
    x2d = x.reshape(M, D)

    tile_m = _pick_tile_m(M)
    m_pad = ((M + tile_m - 1) // tile_m) * tile_m
    if m_pad != M:
        x2d = jnp.pad(x2d, ((0, m_pad - M), (0, 0)))

    row_spec = pl.BlockSpec((tile_m, D), lambda i: (i, 0))
    vec_spec = pl.BlockSpec((1, D), lambda i: (0, 0))      # resident params
    mat_spec = pl.BlockSpec((D, D), lambda i: (0, 0))      # resident weights

    inputs = [x2d, gamma.reshape(1, D), beta.reshape(1, D), W, b_lin.reshape(1, D)]
    in_specs = [row_spec, vec_spec, vec_spec, mat_spec, vec_spec]

    use_dropout = bool(training) and float(p) > 0.0
    if use_dropout:
        if dropout_u is None:
            raise ValueError("training dropout requires dropout_u")
        u2d = dropout_u.reshape(M, D).astype(jnp.float32)
        if m_pad != M:
            u2d = jnp.pad(u2d, ((0, m_pad - M), (0, 0)), constant_values=1.0)
        inputs.append(u2d)
        in_specs.append(row_spec)

    kern = functools.partial(fused_sublayer_kernel,
                             p=float(p), use_dropout=use_dropout)

    out2d = pl.pallas_call(
        kern,
        out_shape=jax.ShapeDtypeStruct((m_pad, D), x.dtype),
        grid=(m_pad // tile_m,),
        in_specs=in_specs,
        out_specs=row_spec,
        compiler_params=pltpu.CompilerParams(
            dimension_semantics=("parallel",)),
    )(*inputs)

    return out2d[:M].reshape(B, S, D)


# --------------------------------- main ------------------------------------ #
if __name__ == "__main__":
    B, S, D = 2, 8, D_MODEL
    key = jax.random.PRNGKey(0)
    kx, kw, kb, ku = jax.random.split(key, 4)

    x = jax.random.normal(kx, (B, S, D), jnp.float32)

    # nn.LayerNorm(d_model) default init
    gamma = jnp.ones((D,), jnp.float32)
    beta = jnp.zeros((D,), jnp.float32)

    # synthetic sublayer: Linear(D, D) + ReLU, deterministic init
    W = jax.random.normal(kw, (D, D), jnp.float32) / jnp.sqrt(D)
    b_lin = jax.random.normal(kb, (D,), jnp.float32) * 0.01

    p_drop = 0.1
    # dropout randomness (host-generated, deterministic); see TODO at top
    u = jax.random.uniform(ku, (B, S, D), jnp.float32)

    out_eval = sublayer_connection(
        x, gamma, beta, W, b_lin, p=p_drop, training=False)
    out_train = sublayer_connection(
        x, gamma, beta, W, b_lin, p=p_drop, training=True, dropout_u=u)
    jax.block_until_ready((out_eval, out_train))

    # ----------------------- plain-JAX reference check ----------------------
    def ref(x, u=None):
        mu = x.mean(-1, keepdims=True)
        var = ((x - mu) ** 2).mean(-1, keepdims=True)
        n = (x - mu) / jnp.sqrt(var + EPS) * gamma + beta
        s = jnp.maximum(n @ W + b_lin, 0.0)
        if u is not None:
            s = jnp.where(u >= p_drop, s / (1.0 - p_drop), 0.0)
        return x + s

    assert out_eval.shape == x.shape and out_train.shape == x.shape
    assert jnp.allclose(out_eval, ref(x), atol=1e-4, rtol=1e-4), "eval mismatch"
    assert jnp.allclose(out_train, ref(x, u), atol=1e-4, rtol=1e-4), "train mismatch"
    print("KERNEL_OK")
</pallas_src>

<mosaic_0001>
module attributes {stable_mosaic.version = 11 : i64} {
  func.func @fused_sublayer_kernel(%arg0: i32, %arg1: memref<16x32xf32, #tpu.memory_space<vmem>>, %arg2: memref<1x32xf32, #tpu.memory_space<vmem>>, %arg3: memref<1x32xf32, #tpu.memory_space<vmem>>, %arg4: memref<32x32xf32, #tpu.memory_space<vmem>>, %arg5: memref<1x32xf32, #tpu.memory_space<vmem>>, %arg6: memref<16x32xf32, #tpu.memory_space<vmem>>) attributes {dimension_semantics = [#tpu.dimension_semantics<parallel>], iteration_bounds = array<i64: 1>, scalar_prefetch = 0 : i64, scratch_operands = 0 : i64, tpu.core_type = #tpu.core_type<tc>, window_params = [{transform_indices = @transform_0, window_bounds = array<i64: 16, 32>}, {pipeline_mode = #tpu.pipeline_mode<synchronous>, transform_indices = @transform_1, window_bounds = array<i64: 1, 32>}, {pipeline_mode = #tpu.pipeline_mode<synchronous>, transform_indices = @transform_2, window_bounds = array<i64: 1, 32>}, {pipeline_mode = #tpu.pipeline_mode<synchronous>, transform_indices = @transform_3, window_bounds = array<i64: 32, 32>}, {pipeline_mode = #tpu.pipeline_mode<synchronous>, transform_indices = @transform_4, window_bounds = array<i64: 1, 32>}, {transform_indices = @transform_5, window_bounds = array<i64: 16, 32>}]} {
    %c0 = arith.constant 0 : index
    %c0_0 = arith.constant 0 : index
    %0 = vector.load %arg1[%c0, %c0_0] : memref<16x32xf32, #tpu.memory_space<vmem>>, vector<16x32xf32>
    %cst = arith.constant dense<0.000000e+00> : vector<16xf32>
    %1 = vector.multi_reduction <add>, %0, %cst [1] : vector<16x32xf32> to vector<16xf32>
    %2 = vector.shape_cast %1 : vector<16xf32> to vector<16x1xf32>
    %cst_1 = arith.constant 3.200000e+01 : f32
    %3 = vector.broadcast %cst_1 : f32 to vector<16x1xf32>
    %4 = arith.divf %2, %3 : vector<16x1xf32>
    %5 = vector.broadcast %4 : vector<16x1xf32> to vector<16x32xf32>
    %6 = arith.subf %0, %5 : vector<16x32xf32>
    %7 = arith.mulf %6, %6 : vector<16x32xf32>
    %cst_2 = arith.constant dense<0.000000e+00> : vector<16xf32>
    %8 = vector.multi_reduction <add>, %7, %cst_2 [1] : vector<16x32xf32> to vector<16xf32>
    %9 = vector.shape_cast %8 : vector<16xf32> to vector<16x1xf32>
    %cst_3 = arith.constant 3.200000e+01 : f32
    %10 = vector.broadcast %cst_3 : f32 to vector<16x1xf32>
    %11 = arith.divf %9, %10 : vector<16x1xf32>
    %cst_4 = arith.constant 9.99999974E-6 : f32
    %12 = vector.broadcast %cst_4 : f32 to vector<16x1xf32>
    %13 = arith.addf %11, %12 : vector<16x1xf32>
    %14 = math.rsqrt %13 : vector<16x1xf32>
    %15 = vector.broadcast %14 : vector<16x1xf32> to vector<16x32xf32>
    %16 = arith.mulf %6, %15 : vector<16x32xf32>
    %c0_5 = arith.constant 0 : index
    %c0_6 = arith.constant 0 : index
    %17 = vector.load %arg2[%c0_5, %c0_6] : memref<1x32xf32, #tpu.memory_space<vmem>>, vector<1x32xf32>
    %18 = vector.broadcast %17 : vector<1x32xf32> to vector<16x32xf32>
    %19 = arith.mulf %16, %18 : vector<16x32xf32>
    %c0_7 = arith.constant 0 : index
    %c0_8 = arith.constant 0 : index
    %20 = vector.load %arg3[%c0_7, %c0_8] : memref<1x32xf32, #tpu.memory_space<vmem>>, vector<1x32xf32>
    %21 = vector.broadcast %20 : vector<1x32xf32> to vector<16x32xf32>
    %22 = arith.addf %19, %21 : vector<16x32xf32>
    %c0_9 = arith.constant 0 : index
    %c0_10 = arith.constant 0 : index
    %23 = vector.load %arg4[%c0_9, %c0_10] : memref<32x32xf32, #tpu.memory_space<vmem>>, vector<32x32xf32>
    %cst_11 = arith.constant dense<0.000000e+00> : vector<16x32xf32>
    %24 = tpu.matmul %22, %23, %cst_11 {dimension_numbers = #tpu.dot_dimension_numbers<[1], [0], [0], [1], [0, 0, 1, 1], [], []>} : vector<16x32xf32>, vector<32x32xf32>, vector<16x32xf32> -> vector<16x32xf32>
    %c0_12 = arith.constant 0 : index
    %c0_13 = arith.constant 0 : index
    %25 = vector.load %arg5[%c0_12, %c0_13] : memref<1x32xf32, #tpu.memory_space<vmem>>, vector<1x32xf32>
    %26 = vector.broadcast %25 : vector<1x32xf32> to vector<16x32xf32>
    %27 = arith.addf %24, %26 : vector<16x32xf32>
    %cst_14 = arith.constant 0.000000e+00 : f32
    %28 = vector.broadcast %cst_14 : f32 to vector<16x32xf32>
    %29 = arith.maximumf %27, %28 : vector<16x32xf32>
    %30 = arith.addf %0, %29 : vector<16x32xf32>
    %c0_15 = arith.constant 0 : index
    %c0_16 = arith.constant 0 : index
    %31 = vector.load %arg6[%c0_15, %c0_16] : memref<16x32xf32, #tpu.memory_space<vmem>>, vector<16x32xf32>
    tpu.vector_store %arg6[%c0_15, %c0_16], %30 {strides = array<i32>} : memref<16x32xf32, #tpu.memory_space<vmem>>, vector<16x32xf32>,
    return
  }
  func.func @transform_0(%arg0: i32) -> (i32, i32) {
    %c0_i32 = arith.constant 0 : i32
    %c0_i32_0 = arith.constant 0 : i32
    return %arg0, %c0_i32 : i32, i32
  }
  func.func @transform_1(%arg0: i32) -> (i32, i32) {
    %c0_i32 = arith.constant 0 : i32
    %c0_i32_0 = arith.constant 0 : i32
    %c0_i32_1 = arith.constant 0 : i32
    return %c0_i32, %c0_i32_0 : i32, i32
  }
  func.func @transform_2(%arg0: i32) -> (i32, i32) {
    %c0_i32 = arith.constant 0 : i32
    %c0_i32_0 = arith.constant 0 : i32
    %c0_i32_1 = arith.constant 0 : i32
    return %c0_i32, %c0_i32_0 : i32, i32
  }
  func.func @transform_3(%arg0: i32) -> (i32, i32) {
    %c0_i32 = arith.constant 0 : i32
    %c0_i32_0 = arith.constant 0 : i32
    %c0_i32_1 = arith.constant 0 : i32
    return %c0_i32, %c0_i32_0 : i32, i32
  }
  func.func @transform_4(%arg0: i32) -> (i32, i32) {
    %c0_i32 = arith.constant 0 : i32
    %c0_i32_0 = arith.constant 0 : i32
    %c0_i32_1 = arith.constant 0 : i32
    return %c0_i32, %c0_i32_0 : i32, i32
  }
  func.func @transform_5(%arg0: i32) -> (i32, i32) {
    %c0_i32 = arith.constant 0 : i32
    %c0_i32_0 = arith.constant 0 : i32
    return %arg0, %c0_i32 : i32, i32
  }
}

</mosaic_0001>

<bundles_post_ra>
// kernel: tpu_custom_call.1
= control target key start
LH: loop header
LB: loop body
LE: loop exit
PB: predicated region body
PF: predicated region fallthrough
CT: control target
= control target key end

     0   :  { %10 = vsyncpa [#allocation3], 0  ;;  %s380_s0 = inlined_call_operand.hbm [shape: f32[16,32], index: 0, kind: input, shape index: {}]   ;;  %s381_s1 = inlined_call_operand.vmem [shape: f32[1,32], index: 1, kind: input, shape index: {}]   ;;  %s382_s2 = inlined_call_operand.vmem [shape: f32[1,32], index: 2, kind: input, shape index: {}]   ;;  %s383_s3 = inlined_call_operand.hbm [shape: f32[32,32], index: 3, kind: input, shape index: {}]   ;;  %s384_s4 = inlined_call_operand.vmem [shape: f32[1,32], index: 4, kind: input, shape index: {}]   ;;  %s385_s5 = inlined_call_operand.hbm [shape: f32[16,32], index: 5, kind: output, shape index: {}]  }
   0x1   :  { %11 = vsyncpa [#allocation6], 0 }
   0x2   :  { %12 = vsyncpa [#allocation4], 0  ;;  %s310_s18 = smov [#allocation2]  }
   0x3   :  { %s18_s19 = sshll.u32 %s310_s18, 4  ;;  %s19_s19 = int_to_ptr.vmem [resolvable:$true] %s18_s19 }
   0x4   :  { %s252_s20 = scalar_lea.vmem %s19_s19, 256  ;;  %p257_p1 = scmp.lt.s32.totalorder %s19_s19, %s19_s19 }
   0x5   :  { %p253_p0 = scmp.ne.s32.totalorder %s19_s19, %s252_s20  ;;  %p258_p2 = scmp.lt.s32.totalorder %s252_s20, %s252_s20 }
   0x7   :  { %p259_p3 = por %p258_p2, %p257_p1 }
   0x9   :  { %p260_p4 = pnand %p259_p3, %p253_p0 }
   0xb   :  { %263 = shalt.err (!%p260_p4)
}
   0xc   :  { %s311_s21 = smov 128   ;;  %s312_s22 = smov 8  }
   0xd   :  { %24 = dma.hbm_to_vmem [thread:$0]  %s380_s0, 256, %s19_s19, [#allocation3], %s311_s21, %s311_s21, %s312_s22  }
   0xe   :  { %s313_s25 = smov [#allocation5]  }
   0xf   :  { %s34_s26 = sshll.u32 %s313_s25, 4  ;;  %s35_s26 = int_to_ptr.vmem [resolvable:$true] %s34_s26 }
  0x10   :  { %s272_s27 = scalar_lea.vmem %s35_s26, 512  ;;  %p277_p6 = scmp.lt.s32.totalorder %s35_s26, %s35_s26 }
  0x11   :  { %p273_p5 = scmp.ne.s32.totalorder %s35_s26, %s272_s27  ;;  %p278_p7 = scmp.lt.s32.totalorder %s272_s27, %s272_s27 }
  0x13   :  { %p279_p8 = por %p278_p7, %p277_p6 }
  0x15   :  { %p280_p9 = pnand %p279_p8, %p273_p5 }
  0x17   :  { %283 = shalt.err (!%p280_p9)
}
  0x18   :  { %40 = dma.hbm_to_vmem [thread:$0]  %s383_s3, 512, %s35_s26, [#allocation6], %s311_s21, %s311_s21, %s312_s22  }
  0x19   :  { %304 = dma.done.wait [#allocation3], 256  }
  0x1a   :  { %305 = vsyncadd [#allocation3], 4294967040 }
  0x1b   :  { %306 = dma.done.wait [#allocation6], 512  }
  0x1c   :  { %307 = vsyncadd [#allocation6], 4294966784  ;;  %vm51_vm0 = vcmask 261120   ;;  %v49_v0 = vld [vmem:[#allocation2] sm:$0xff]  ;;  %v50_v1 = vld [vmem:[#allocation2 + $0x8] sm:$0xff] }
  0x1d   :  { %v52_v2 = vsel %vm51_vm0, %v49_v0, 0.0  ;;  %v55_v3 = vsel %vm51_vm0, %v50_v1, 0.0  ;;  %v100_v14 = vld [vmem:[#allocation5 + $0x18] sm:$0xff]  ;;  %v99_v15 = vld [vmem:[#allocation5 + $0x10] sm:$0xff]  ;;  %v98_v16 = vld [vmem:[#allocation5 + $0x8] sm:$0xff] }
  0x1e   :  { %53 = vadd.xlane.f32.xlu0 %v52_v2  ;;  %224 = vmatprep.subr.mxu0 %v100_v14  ;;  %v97_v17 = vld [vmem:[#allocation5] sm:$0xff]  ;;  %v213_v25 = vld [vmem:[%s381_s1] ss:$0 sm:$0xff]  ;;  %s314_s1 = smov [#allocation7]  }
  0x1f   :  { %225 = vmatpush3.msra.mxu0 %v100_v14  ;;  %v214_v27 = vld [vmem:[%s382_s2] ss:$0 sm:$0xff]  ;;  %s200_s2 = sshll.u32 %s314_s1, 4  ;;  %s201_s2 = int_to_ptr.vmem [resolvable:$true] %s200_s2 }
  0x20   :  { %226 = vmatprep.subr.mxu0 %v99_v15  ;;  %v215_v34 = vld [vmem:[%s384_s4] ss:$0 sm:$0xff]  ;;  %s284_s9 = scalar_lea.vmem %s201_s2, 256  ;;  %p289_p11 = scmp.lt.s32.totalorder %s201_s2, %s201_s2 }
  0x21   :  { %227 = vmatpush3.msra.mxu0 %v99_v15  ;;  %p285_p10 = scmp.ne.s32.totalorder %s201_s2, %s284_s9  ;;  %p290_p12 = scmp.lt.s32.totalorder %s284_s9, %s284_s9 }
  0x22   :  { %56 = vadd.xlane.f32.xlu0 %v55_v3  ;;  %228 = vmatprep.subr.mxu0 %v98_v16 }
  0x23   :  { %229 = vmatpush3.msra.mxu0 %v98_v16  ;;  %p291_p13 = por %p290_p12, %p289_p11 }
  0x24   :  { %230 = vmatprep.subr.mxu0 %v97_v17 }
  0x25   :  { %231 = vmatpush3.msra.mxu0 %v97_v17  ;;  %p292_p0 = pnand %p291_p13, %p285_p10 }
  0xa7   :  { %v54_v4 = vpop.xlane.xlu0 %53 }
  0xa8   :  { %v59_v5 = vmul.f32 0.03125, %v54_v4 }
  0xaa   :  { %v61_v6 = vsub.f32 %v49_v0, %v59_v5 }
  0xab   :  { %v57_v7 = vpop.xlane.xlu0 %56 }
  0xac   :  { %v60_v8 = vmul.f32 0.03125, %v57_v7  ;;  %v63_v9 = vmul.f32 %v61_v6, %v61_v6 }
  0xae   :  { %v62_v10 = vsub.f32 %v50_v1, %v60_v8  ;;  %v65_v11 = vsel %vm51_vm0, %v63_v9, 0.0 }
  0xaf   :  { %66 = vadd.xlane.f32.xlu1 %v65_v11 }
  0xb0   :  { %v64_v12 = vmul.f32 %v62_v10, %v62_v10 }
  0xb2   :  { %v68_v13 = vsel %vm51_vm0, %v64_v12, 0.0 }
  0xb3   :  { %69 = vadd.xlane.f32.xlu1 %v68_v13 }
 0x138   :  { %v67_v18 = vpop.xlane.xlu1 %66 }
 0x139   :  { %v71_v19 = vmul.f32 0.03125, %v67_v18 }
 0x13b   :  { %v73_v20 = vadd.f32 1e-05, %v71_v19 }
 0x13c   :  { %v70_v21 = vpop.xlane.xlu1 %69 }
 0x13d   :  { %240 = vrsqrt.f32 %v73_v20  ;;  %v72_v22 = vmul.f32 0.03125, %v70_v21 }
 0x13f   :  { %v74_v23 = vadd.f32 1e-05, %v72_v22 }
 0x141   :  { %242 = vrsqrt.f32 %v74_v23 }
 0x14a   :  { %v241_v24 = vpop.eup %240 }
 0x14b   :  { %v77_v26 = vmul.f32 %v241_v24, %v61_v6 }
 0x14d   :  { %v86_v28 = vmul.f32 %v213_v25, %v77_v26 }
 0x14e   :  { %v243_v29 = vpop.eup %242 }
 0x14f   :  { %v78_v30 = vmul.f32 %v243_v29, %v62_v10  ;;  %v95_v31 = vadd.f32 %v214_v27, %v86_v28 }
 0x151   :  { %v87_v32 = vmul.f32 %v213_v25, %v78_v30  ;;  %232 = vmatprep.mubr.msk.f32.mxu0 %vm51_vm0, %v95_v31 }
 0x153   :  { %v96_v33 = vadd.f32 %v214_v27, %v87_v32 }
 0x155   :  { %233 = vmatmul.mubr.msk.f32.vlgmr.msra.gmra.mxu0 %vm51_vm0, %v96_v33 }
 0x215   :  { %v234_v35 = vpop.f32.mrf.mxu0 }
 0x216   :  { %v186_v36 = vadd.f32 %v234_v35, %v215_v34 }
 0x217   :  { %v180_v37 = vpop.f32.mrf.mxu0 }
 0x218   :  { %v190_v38 = vmax.f32 %v186_v36, 0.0  ;;  %v181_v39 = vadd.f32 %v215_v34, %v180_v37 }
 0x21a   :  { %v192_v40 = vadd.f32 %v190_v38, %v50_v1  ;;  %v189_v41 = vmax.f32 %v181_v39, 0.0 }
 0x21c   :  { %194 = vst.msk [vmem:[#allocation7 + $0x8] sm:$0xff] %vm51_vm0, %v192_v40  ;;  %v191_v42 = vadd.f32 %v189_v41, %v49_v0 }
 0x21e   :  { %193 = vst.msk [vmem:[#allocation7] sm:$0xff] %vm51_vm0, %v191_v42 }
 0x21f   :  { %295 = shalt.err (!%p292_p0)
}
 0x220   :  { %206 = dma.vmem_to_hbm [thread:$0]  %s201_s2, 256, %s385_s5, [#allocation4], %s311_s21, %s311_s21, %s312_s22  }
 0x221   :  { %308 = dma.done.wait [#allocation4], 256  }
 0x222   :  { %309 = vsyncadd [#allocation4], 4294967040 }
 0x223   :  { %210 = vsyncpa [#allocation3], 1 }
 0x224   :  { %211 = vsyncpa [#allocation6], 1 }
 0x225   :  { %212 = vsyncpa [#allocation4], 1 }

</bundles_post_ra>
